<compile_context>
chip_gen: v7x
topology: tpu7x:2x2x1
jax: 0.10.0
libtpu: 0.0.40
codegen_flags: <defaults>
</compile_context>

<pallas_src>
import jax
import jax.numpy as jnp
from jax.experimental import pallas as pl
from jax.experimental.pallas import tpu as pltpu


# ----------------------------------------------------------------------------
# Kernels
# ----------------------------------------------------------------------------

def _bidir_head_fused_kernel(x_ref, wf_ref, wb_ref, wg_ref,
                             bf_ref, bb_ref, bg_ref, o_ref):
    """Weights-resident path: full-(K,N) weights, grid only over M."""
    x = x_ref[...]
    f = jnp.dot(x, wf_ref[...], preferred_element_type=jnp.float32) + bf_ref[...]
    b = jnp.dot(x, wb_ref[...], preferred_element_type=jnp.float32) + bb_ref[...]
    g = jax.nn.sigmoid(
        jnp.dot(x, wg_ref[...], preferred_element_type=jnp.float32) + bg_ref[...])
    # g*f + (1-g)*b == b + g*(f-b)  (one fewer multiply)
    o_ref[...] = (b + g * (f - b)).astype(o_ref.dtype)


def _bidir_head_tiled_kernel(x_ref, wf_ref, wb_ref, wg_ref,
                             bf_ref, bb_ref, bg_ref, o_ref,
                             acc_f, acc_b, acc_g):
    """Tiled path: grid (M, N, K), f32 accumulators persist across K."""
    k = pl.program_id(2)

    @pl.when(k == 0)
    def _():
        # Seed accumulators with the broadcast biases: frees the epilogue and
        # hides the three (bm,bn) VPU adds under MXU slack of the first K step.
        acc_f[...] = jnp.zeros_like(acc_f) + bf_ref[...].astype(jnp.float32)
        acc_b[...] = jnp.zeros_like(acc_b) + bb_ref[...].astype(jnp.float32)
        acc_g[...] = jnp.zeros_like(acc_g) + bg_ref[...].astype(jnp.float32)

    x = x_ref[...]
    acc_f[...] += jnp.dot(x, wf_ref[...], preferred_element_type=jnp.float32)
    acc_b[...] += jnp.dot(x, wb_ref[...], preferred_element_type=jnp.float32)
    acc_g[...] += jnp.dot(x, wg_ref[...], preferred_element_type=jnp.float32)

    @pl.when(k == pl.num_programs(2) - 1)
    def _():
        f = acc_f[...]
        b = acc_b[...]
        g = jax.nn.sigmoid(acc_g[...])
        o_ref[...] = (b + g * (f - b)).astype(o_ref.dtype)


# ----------------------------------------------------------------------------
# Wrapper
# ----------------------------------------------------------------------------

def prepare_bidirectional_head_params(w_f, b_f, w_b, b_b, w_g, b_g,
                                      *, compute_dtype=None):
    """One-time weight preparation.

    * Folds torch.flip(..., dims=[-1]) into the backward weights/bias (exact),
      so the per-call forward has no lane-reverse and no extra HBM pass.
    * Optionally casts the three weight matrices to `compute_dtype`
      (e.g. jnp.bfloat16) for the MXU-native / half-DMA fast path.
      Biases are kept in f32 (the epilogue always runs in f32).
    """
    w_b = w_b[:, ::-1]
    b_b = b_b[::-1]
    if compute_dtype is not None:
        w_f = w_f.astype(compute_dtype)
        w_b = w_b.astype(compute_dtype)
        w_g = w_g.astype(compute_dtype)
    b_f = b_f.astype(jnp.float32)
    b_b = b_b.astype(jnp.float32)
    b_g = b_g.astype(jnp.float32)
    return (w_f, b_f, w_b, b_b, w_g, b_g)


def _round_up(v, m):
    return -(-v // m) * m


def _pad2(a, rows, cols):
    r, c = a.shape
    if (r, c) != (rows, cols):
        a = jnp.pad(a, ((0, rows - r), (0, cols - c)))
    return a


def bidirectional_head_forward(x, params, *, tm=512, tn=512, tk=1024,
                               weight_resident_budget=12 * 2**20):
    """BidirectionalHeadLayer.forward.

    x: (..., K). params: output of prepare_bidirectional_head_params,
    weights in (K, N) layout, biases (N,) f32.
    """
    assert tm % 8 == 0 and tn % 128 == 0 and tk % 128 == 0
    w_f, b_f, w_b, b_b, w_g, b_g = params

    orig_shape = x.shape
    x2 = x.reshape(-1, orig_shape[-1])
    M, K = x2.shape
    Kw, N = w_f.shape
    assert K == Kw, "input_size mismatch"
    out_dtype = x.dtype
    out_final_shape = orig_shape[:-1] + (N,)

    if M == 0 or N == 0:
        return jnp.zeros(out_final_shape, dtype=out_dtype)

    # Compute dtype follows the (prepared) weights; cast x to match.
    compute_dtype = w_f.dtype
    if x2.dtype != compute_dtype:
        x2 = x2.astype(compute_dtype)
    x_sz = jnp.dtype(compute_dtype).itemsize
    w_sz = jnp.dtype(compute_dtype).itemsize
    o_sz = jnp.dtype(out_dtype).itemsize

    # Hardware-aligned padded dims (lane-dense stores need N % 128 == 0).
    Mp0 = _round_up(M, 8)
    Np0 = _round_up(N, 128)
    Kp0 = _round_up(K, 128)

    single_n = Np0 <= tn
    single_k = Kp0 <= tk
    weights_resident = (single_n and single_k and
                        3 * Kp0 * Np0 * w_sz <= weight_resident_budget)

    def _split_m_for_megacore(Mp, bm, other_tiles):
        # Give both v7x TensorCores work when the grid would be a single tile.
        if other_tiles * (Mp // bm) < 2 and Mp >= 16:
            bm = _round_up(-(-Mp // 2), 8)
            Mp = _round_up(Mp, bm)
        return Mp, bm

    if weights_resident:
        # ---- Fast path: weights loaded exactly once (constant index_map). ----
        Np, Kp = Np0, Kp0
        if Mp0 <= tm:
            bm, Mp = Mp0, Mp0
        else:
            bm, Mp = tm, _round_up(M, tm)
        Mp, bm = _split_m_for_megacore(Mp, bm, 1)

        grid = (Mp // bm,)
        in_specs = [
            pl.BlockSpec((bm, Kp), lambda i: (i, 0)),
            pl.BlockSpec((Kp, Np), lambda i: (0, 0)),
            pl.BlockSpec((Kp, Np), lambda i: (0, 0)),
            pl.BlockSpec((Kp, Np), lambda i: (0, 0)),
            pl.BlockSpec((1, Np), lambda i: (0, 0)),
            pl.BlockSpec((1, Np), lambda i: (0, 0)),
            pl.BlockSpec((1, Np), lambda i: (0, 0)),
        ]
        out_specs = pl.BlockSpec((bm, Np), lambda i: (i, 0))
        scratch_shapes = []
        dim_semantics = ("parallel",)
        kernel = _bidir_head_fused_kernel

        footprint = (2 * bm * Kp * x_sz          # x double-buffer
                     + 2 * 3 * Kp * Np * w_sz    # weights (conservative x2)
                     + 2 * bm * Np * o_sz        # out double-buffer
                     + 2 * 3 * Np * 4)           # biases
        bytes_accessed = (Mp * Kp * x_sz + 3 * Kp * Np * w_sz
                          + 3 * Np * 4 + Mp * Np * o_sz)
    else:
        # ---- Tiled path: grid (M, N, K) with f32 accumulators over K. ----
        bn, Np = (Np0, Np0) if single_n else (tn, _round_up(N, tn))
        bk, Kp = (Kp0, Kp0) if single_k else (tk, _round_up(K, tk))
        if Mp0 <= tm:
            bm, Mp = Mp0, Mp0
        else:
            bm, Mp = tm, _round_up(M, tm)
        Mp, bm = _split_m_for_megacore(Mp, bm, Np // bn)

        grid = (Mp // bm, Np // bn, Kp // bk)
        in_specs = [
            pl.BlockSpec((bm, bk), lambda i, j, k: (i, k)),
            pl.BlockSpec((bk, bn), lambda i, j, k: (k, j)),
            pl.BlockSpec((bk, bn), lambda i, j, k: (k, j)),
            pl.BlockSpec((bk, bn), lambda i, j, k: (k, j)),
            pl.BlockSpec((1, bn), lambda i, j, k: (0, j)),
            pl.BlockSpec((1, bn), lambda i, j, k: (0, j)),
            pl.BlockSpec((1, bn), lambda i, j, k: (0, j)),
        ]
        out_specs = pl.BlockSpec((bm, bn), lambda i, j, k: (i, j))
        scratch_shapes = [pltpu.VMEM((bm, bn), jnp.float32)] * 3
        dim_semantics = ("parallel", "parallel", "arbitrary")
        kernel = _bidir_head_tiled_kernel

        footprint = (2 * bm * bk * x_sz
                     + 2 * 3 * bk * bn * w_sz
                     + 2 * bm * bn * o_sz
                     + 3 * bm * bn * 4            # accumulators
                     + 2 * 3 * bn * 4)
        n_m_tiles = Mp // bm
        n_n_tiles = Np // bn
        # Include revisit traffic: x is re-read per N tile, weights per M tile.
        bytes_accessed = (n_n_tiles * Mp * Kp * x_sz
                          + n_m_tiles * 3 * Kp * Np * w_sz
                          + 3 * Np * 4 + Mp * Np * o_sz)

    # Pad operands to the padded dims chosen above.
    x2 = _pad2(x2, Mp, Kp)
    wf = _pad2(w_f, Kp, Np)
    wb = _pad2(w_b, Kp, Np)
    wg = _pad2(w_g, Kp, Np)
    bf = _pad2(b_f.reshape(1, -1), 1, Np)
    bb = _pad2(b_b.reshape(1, -1), 1, Np)
    bg = _pad2(b_g.reshape(1, -1), 1, Np)

    vmem_limit = int(min(100 * 2**20,
                         max(32 * 2**20, footprint * 5 // 4 + (1 << 20))))

    out = pl.pallas_call(
        kernel,
        out_shape=jax.ShapeDtypeStruct((Mp, Np), out_dtype),
        grid_spec=pltpu.PrefetchScalarGridSpec(
            num_scalar_prefetch=0,
            grid=grid,
            in_specs=in_specs,
            out_specs=out_specs,
            scratch_shapes=scratch_shapes,
        ),
        compiler_params=pltpu.CompilerParams(
            dimension_semantics=dim_semantics,
            vmem_limit_bytes=vmem_limit,
        ),
        cost_estimate=pl.CostEstimate(
            flops=int(6 * Mp * Np * Kp + 7 * Mp * Np),
            transcendentals=int(Mp * Np),
            bytes_accessed=int(bytes_accessed),
        ),
    )(x2, wf, wb, wg, bf, bb, bg)

    if (Mp, Np) != (M, N):
        out = out[:M, :N]
    return out.reshape(out_final_shape)


# ----------------------------------------------------------------------------
# Reference + demo
# ----------------------------------------------------------------------------

def _reference_forward(x, w_f, b_f, w_b, b_b, w_g, b_g):
    f = x @ w_f + b_f
    b = jnp.flip(x @ w_b + b_b, axis=-1)
    g = jax.nn.sigmoid(x @ w_g + b_g)
    return g * f + (1.0 - g) * b


if __name__ == "__main__":
    key = jax.random.PRNGKey(0)
    ks = jax.random.split(key, 7)

    batch, seq, input_size, output_size = 2, 8, 32, 48
    x = jax.random.normal(ks[0], (batch, seq, input_size), dtype=jnp.float32)
    w_f = 0.1 * jax.random.normal(ks[1], (input_size, output_size), jnp.float32)
    b_f = 0.1 * jax.random.normal(ks[2], (output_size,), jnp.float32)
    w_b = 0.1 * jax.random.normal(ks[3], (input_size, output_size), jnp.float32)
    b_b = 0.1 * jax.random.normal(ks[4], (output_size,), jnp.float32)
    w_g = 0.1 * jax.random.normal(ks[5], (input_size, output_size), jnp.float32)
    b_g = 0.1 * jax.random.normal(ks[6], (output_size,), jnp.float32)

    y_ref = _reference_forward(x, w_f, b_f, w_b, b_b, w_g, b_g)

    # 1) f32, weights-resident fast path (exact vs reference).
    params_f32 = prepare_bidirectional_head_params(w_f, b_f, w_b, b_b, w_g, b_g)
    y = bidirectional_head_forward(x, params_f32)
    jax.block_until_ready(y)
    assert y.shape == (batch, seq, output_size), y.shape
    assert y.dtype == x.dtype
    assert bool(jnp.allclose(y, y_ref, atol=1e-5, rtol=1e-5)), float(
        jnp.max(jnp.abs(y - y_ref)))

    # 2) f32, tiled (K-reduction) path forced, to exercise the large-shape kernel.
    y_tiled = bidirectional_head_forward(
        x, params_f32, tm=8, tn=128, tk=128, weight_resident_budget=0)
    jax.block_until_ready(y_tiled)
    assert bool(jnp.allclose(y_tiled, y_ref, atol=1e-5, rtol=1e-5)), float(
        jnp.max(jnp.abs(y_tiled - y_ref)))

    # 3) bf16 compute path (MXU-native on v6e/v7x; f32 accumulate + epilogue).
    params_bf16 = prepare_bidirectional_head_params(
        w_f, b_f, w_b, b_b, w_g, b_g, compute_dtype=jnp.bfloat16)
    y16 = bidirectional_head_forward(x, params_bf16)
    jax.block_until_ready(y16)
    assert y16.shape == (batch, seq, output_size)
    assert y16.dtype == x.dtype
    assert bool(jnp.allclose(y16, y_ref, atol=3e-2, rtol=3e-2)), float(
        jnp.max(jnp.abs(y16 - y_ref)))

    print("KERNEL_OK")
</pallas_src>

<mosaic_0001>
module attributes {stable_mosaic.version = 11 : i64} {
  func.func @_bidir_head_fused_kernel(%arg0: i32, %arg1: memref<8x128xf32, #tpu.memory_space<vmem>>, %arg2: memref<128x128xf32, #tpu.memory_space<vmem>>, %arg3: memref<128x128xf32, #tpu.memory_space<vmem>>, %arg4: memref<128x128xf32, #tpu.memory_space<vmem>>, %arg5: memref<1x128xf32, #tpu.memory_space<vmem>>, %arg6: memref<1x128xf32, #tpu.memory_space<vmem>>, %arg7: memref<1x128xf32, #tpu.memory_space<vmem>>, %arg8: memref<8x128xf32, #tpu.memory_space<vmem>>) attributes {dimension_semantics = [#tpu.dimension_semantics<parallel>], iteration_bounds = array<i64: 2>, scalar_prefetch = 0 : i64, scratch_operands = 0 : i64, tpu.core_type = #tpu.core_type<tc>, window_params = [{transform_indices = @transform_0, window_bounds = array<i64: 8, 128>}, {pipeline_mode = #tpu.pipeline_mode<synchronous>, transform_indices = @transform_1, window_bounds = array<i64: 128, 128>}, {pipeline_mode = #tpu.pipeline_mode<synchronous>, transform_indices = @transform_2, window_bounds = array<i64: 128, 128>}, {pipeline_mode = #tpu.pipeline_mode<synchronous>, transform_indices = @transform_3, window_bounds = array<i64: 128, 128>}, {pipeline_mode = #tpu.pipeline_mode<synchronous>, transform_indices = @transform_4, window_bounds = array<i64: 1, 128>}, {pipeline_mode = #tpu.pipeline_mode<synchronous>, transform_indices = @transform_5, window_bounds = array<i64: 1, 128>}, {pipeline_mode = #tpu.pipeline_mode<synchronous>, transform_indices = @transform_6, window_bounds = array<i64: 1, 128>}, {transform_indices = @transform_7, window_bounds = array<i64: 8, 128>}]} {
    %c0 = arith.constant 0 : index
    %c0_0 = arith.constant 0 : index
    %0 = vector.load %arg1[%c0, %c0_0] : memref<8x128xf32, #tpu.memory_space<vmem>>, vector<8x128xf32>
    %c0_1 = arith.constant 0 : index
    %c0_2 = arith.constant 0 : index
    %1 = vector.load %arg2[%c0_1, %c0_2] : memref<128x128xf32, #tpu.memory_space<vmem>>, vector<128x128xf32>
    %cst = arith.constant dense<0.000000e+00> : vector<8x128xf32>
    %2 = tpu.matmul %0, %1, %cst {dimension_numbers = #tpu.dot_dimension_numbers<[1], [0], [0], [1], [0, 0, 1, 1], [], []>} : vector<8x128xf32>, vector<128x128xf32>, vector<8x128xf32> -> vector<8x128xf32>
    %c0_3 = arith.constant 0 : index
    %c0_4 = arith.constant 0 : index
    %3 = vector.load %arg5[%c0_3, %c0_4] : memref<1x128xf32, #tpu.memory_space<vmem>>, vector<1x128xf32>
    %4 = vector.broadcast %3 : vector<1x128xf32> to vector<8x128xf32>
    %5 = arith.addf %2, %4 : vector<8x128xf32>
    %c0_5 = arith.constant 0 : index
    %c0_6 = arith.constant 0 : index
    %6 = vector.load %arg3[%c0_5, %c0_6] : memref<128x128xf32, #tpu.memory_space<vmem>>, vector<128x128xf32>
    %cst_7 = arith.constant dense<0.000000e+00> : vector<8x128xf32>
    %7 = tpu.matmul %0, %6, %cst_7 {dimension_numbers = #tpu.dot_dimension_numbers<[1], [0], [0], [1], [0, 0, 1, 1], [], []>} : vector<8x128xf32>, vector<128x128xf32>, vector<8x128xf32> -> vector<8x128xf32>
    %c0_8 = arith.constant 0 : index
    %c0_9 = arith.constant 0 : index
    %8 = vector.load %arg6[%c0_8, %c0_9] : memref<1x128xf32, #tpu.memory_space<vmem>>, vector<1x128xf32>
    %9 = vector.broadcast %8 : vector<1x128xf32> to vector<8x128xf32>
    %10 = arith.addf %7, %9 : vector<8x128xf32>
    %c0_10 = arith.constant 0 : index
    %c0_11 = arith.constant 0 : index
    %11 = vector.load %arg4[%c0_10, %c0_11] : memref<128x128xf32, #tpu.memory_space<vmem>>, vector<128x128xf32>
    %cst_12 = arith.constant dense<0.000000e+00> : vector<8x128xf32>
    %12 = tpu.matmul %0, %11, %cst_12 {dimension_numbers = #tpu.dot_dimension_numbers<[1], [0], [0], [1], [0, 0, 1, 1], [], []>} : vector<8x128xf32>, vector<128x128xf32>, vector<8x128xf32> -> vector<8x128xf32>
    %c0_13 = arith.constant 0 : index
    %c0_14 = arith.constant 0 : index
    %13 = vector.load %arg7[%c0_13, %c0_14] : memref<1x128xf32, #tpu.memory_space<vmem>>, vector<1x128xf32>
    %14 = vector.broadcast %13 : vector<1x128xf32> to vector<8x128xf32>
    %15 = arith.addf %12, %14 : vector<8x128xf32>
    %16 = arith.negf %15 : vector<8x128xf32>
    %17 = math.exp %16 : vector<8x128xf32>
    %cst_15 = arith.constant 1.000000e+00 : f32
    %18 = vector.broadcast %cst_15 : f32 to vector<8x128xf32>
    %19 = arith.addf %18, %17 : vector<8x128xf32>
    %20 = arith.divf %18, %19 : vector<8x128xf32>
    %21 = arith.subf %5, %10 : vector<8x128xf32>
    %22 = arith.mulf %20, %21 : vector<8x128xf32>
    %23 = arith.addf %10, %22 : vector<8x128xf32>
    %c0_16 = arith.constant 0 : index
    %c0_17 = arith.constant 0 : index
    %24 = vector.load %arg8[%c0_16, %c0_17] : memref<8x128xf32, #tpu.memory_space<vmem>>, vector<8x128xf32>
    tpu.vector_store %arg8[%c0_16, %c0_17], %23 {strides = array<i32>} : memref<8x128xf32, #tpu.memory_space<vmem>>, vector<8x128xf32>,
    return
  }
  func.func @transform_0(%arg0: i32) -> (i32, i32) {
    %c0_i32 = arith.constant 0 : i32
    %c0_i32_0 = arith.constant 0 : i32
    return %arg0, %c0_i32 : i32, i32
  }
  func.func @transform_1(%arg0: i32) -> (i32, i32) {
    %c0_i32 = arith.constant 0 : i32
    %c0_i32_0 = arith.constant 0 : i32
    %c0_i32_1 = arith.constant 0 : i32
    return %c0_i32, %c0_i32_0 : i32, i32
  }
  func.func @transform_2(%arg0: i32) -> (i32, i32) {
    %c0_i32 = arith.constant 0 : i32
    %c0_i32_0 = arith.constant 0 : i32
    %c0_i32_1 = arith.constant 0 : i32
    return %c0_i32, %c0_i32_0 : i32, i32
  }
  func.func @transform_3(%arg0: i32) -> (i32, i32) {
    %c0_i32 = arith.constant 0 : i32
    %c0_i32_0 = arith.constant 0 : i32
    %c0_i32_1 = arith.constant 0 : i32
    return %c0_i32, %c0_i32_0 : i32, i32
  }
  func.func @transform_4(%arg0: i32) -> (i32, i32) {
    %c0_i32 = arith.constant 0 : i32
    %c0_i32_0 = arith.constant 0 : i32
    %c0_i32_1 = arith.constant 0 : i32
    return %c0_i32, %c0_i32_0 : i32, i32
  }
  func.func @transform_5(%arg0: i32) -> (i32, i32) {
    %c0_i32 = arith.constant 0 : i32
    %c0_i32_0 = arith.constant 0 : i32
    %c0_i32_1 = arith.constant 0 : i32
    return %c0_i32, %c0_i32_0 : i32, i32
  }
  func.func @transform_6(%arg0: i32) -> (i32, i32) {
    %c0_i32 = arith.constant 0 : i32
    %c0_i32_0 = arith.constant 0 : i32
    %c0_i32_1 = arith.constant 0 : i32
    return %c0_i32, %c0_i32_0 : i32, i32
  }
  func.func @transform_7(%arg0: i32) -> (i32, i32) {
    %c0_i32 = arith.constant 0 : i32
    %c0_i32_0 = arith.constant 0 : i32
    return %arg0, %c0_i32 : i32, i32
  }
}

</mosaic_0001>

<bundles_post_ra>
// kernel: tpu_custom_call.1
= control target key start
LH: loop header
LB: loop body
LE: loop exit
PB: predicated region body
PF: predicated region fallthrough
CT: control target
= control target key end

     0   :  { %12 = vsyncpa [#allocation3], 0  ;;  %s1626_s0 = inlined_call_operand.hbm [shape: f32[16,128], index: 0, kind: input, shape index: {}]   ;;  %s1627_s1 = inlined_call_operand.hbm [shape: f32[128,128], index: 1, kind: input, shape index: {}]   ;;  %s1628_s2 = inlined_call_operand.hbm [shape: f32[128,128], index: 2, kind: input, shape index: {}]   ;;  %s1629_s3 = inlined_call_operand.hbm [shape: f32[128,128], index: 3, kind: input, shape index: {}]   ;;  %s1630_s4 = inlined_call_operand.vmem [shape: f32[1,128], index: 4, kind: input, shape index: {}]   ;;  %s1631_s5 = inlined_call_operand.vmem [shape: f32[1,128], index: 5, kind: input, shape index: {}]   ;;  %s1632_s6 = inlined_call_operand.vmem [shape: f32[1,128], index: 6, kind: input, shape index: {}]   ;;  %s1633_s7 = inlined_call_operand.hbm [shape: f32[16,128], index: 7, kind: output, shape index: {}]  }
   0x1   :  { %14 = vsyncpa [#allocation3 + $0x1], 0 }
   0x2   :  { %15 = vsyncpa [#allocation6], 0 }
   0x3   :  { %16 = vsyncpa [#allocation9], 0 }
   0x4   :  { %17 = vsyncpa [#allocation4], 0 }
   0x5   :  { %19 = vsyncpa [#allocation4 + $0x1], 0  ;;  %s1317_s24 = smov 0   ;;  %s1319_s25 = smov 0  }
   0x6   :  { %s1321_s26 = smov 0   ;;  %s1323_s27 = smov 0  }
   0x7 LB: > { %s1338_s28 = sadd.s32 4294967295, %s1265_s27   ;;  %s741_s29 = sadd.s32 4294967294, %s1265_s27   ;;  %s1265_s27 = sphi %s1323_s27, %s1659_s27   ;;  %s1261_s26 = sphi %s1321_s26, %s1658_s26   ;;  %s1257_s25 = sphi %s1319_s25, %s1657_s25   ;;  %s1253_s24 = sphi %s1317_s24, %s1656_s24  }
   0x8   : > { %p45_p0 = scmp.ne.s32.totalorder %s1257_s25, %s1253_s24  ;;  %p1634_p1 = scmp.eq.s32.totalorder %s1338_s28, 0 }
   0x9   : > { %p201_p3 = scmp.eq.s32.totalorder %s741_s29, 1  ;;  %p742_p5 = scmp.ge.s32.totalorder %s1265_s27, 1 }
   0xa   : > { %p1347_p4 = por %p1634_p1, %p45_p0  ;;  %p208_p7 = scmp.lt.s32.totalorder %s1265_s27, 3 }
   0xb   : > { %p1352_p6 = por %p201_p3, %p45_p0  ;;  %s1267_s10 = smov [#allocation5]  }
   0xc   : > { %s1638_s30 = scalar_select %p1347_p4, 1, 0 }
   0xd   : > { %s1639_s8 = scalar_select %p1352_p6, 1, 0 }
   0xe   : > { %p1357_p8 = pnand %p742_p5, %p208_p7  ;;  %s220_s11 = sshll.u32 %s1267_s10, 4  ;;  %s1361_s11 = int_to_ptr.vmem [resolvable:$true] %s220_s11 }
   0xf   : > { %1640 = sst [smem:[#allocation15_spill]] %s1639_s8  ;;  %s1268_s13 = smov [#allocation7]  }
  0x10   : > { %s1641_s9 = scalar_select %p1357_p8, 1, 0 }
  0x11   : > { %p1007_p9 = pneg %p1357_p8  ;;  %s233_s14 = sshll.u32 %s1268_s13, 4  ;;  %s1372_s14 = int_to_ptr.vmem [resolvable:$true] %s233_s14 }
  0x12   : > { %s1269_s15 = smov [#allocation8]   ;;  %s1077_s19 = scalar_lea.hbm %s1627_s1, 2048 }
  0x13   : > { %p1368_p11 = pnand %p1007_p9, %p1634_p1  ;;  %s1374_s16 = sshll.u32 %s1269_s15, 4  ;;  %s247_s16 = int_to_ptr.vmem [resolvable:$true] %s1374_s16 }
  0x14   : > { %p1078_p12 = scmp.ne.s32.totalorder %s1627_s1, %s1077_s19  ;;  %p1084_p5 = scmp.lt.u32.totalorder %s1077_s19, %s1627_s1 }
  0x15   : > { %p1384_p13 = pneg %p1368_p11 }
  0x17   : > { %p1080_p0 = pnand %p1384_p13, %p1078_p12 }
  0x19   : > { %p1081_p3 = pneg %p1080_p0 }
  0x1b   : > { %p1086_p7 = pnand %p1084_p5, %p1081_p3 }
  0x1d   : > { %1089 = shalt.err (!%p1086_p7)
}
  0x1e   : > { %s1090_s10 = scalar_lea.vmem %s1361_s11, 2048  ;;  %p1098_p2 = scmp.lt.s32.totalorder %s1361_s11, %s1361_s11 }
  0x1f   : > { %p1091_p9 = scmp.ne.s32.totalorder %s1361_s11, %s1090_s10  ;;  %p1099_p6 = scmp.lt.s32.totalorder %s1090_s10, %s1090_s10 }
  0x21   : > { %p1093_p10 = pnand %p1091_p9, %p1384_p13  ;;  %p1100_p12 = por %p1099_p6, %p1098_p2 }
  0x23   : > { %p1094_p1 = pneg %p1093_p10 }
  0x25   : > { %p1101_p0 = pnand %p1100_p12, %p1094_p1 }
  0x27   : > { %1104 = shalt.err (!%p1101_p0)
}
  0x28   : > { %s1270_s13 = smov 128   ;;  %s1271_s15 = smov 8  }
  0x29   : > { %1010 = dma.hbm_to_vmem [thread:$0]  (!%p1368_p11), %s1627_s1, 2048, %s1361_s11, [#allocation6], %s1270_s13, %s1270_s13, %s1271_s15  }
  0x2a   : > { %s1105_s21 = scalar_lea.hbm %s1628_s2, 2048 }
  0x2b   : > { %p1106_p1 = scmp.ne.s32.totalorder %s1628_s2, %s1105_s21  ;;  %p1112_p10 = scmp.lt.u32.totalorder %s1105_s21, %s1628_s2 }
  0x2d   : > { %p1108_p2 = pnand %p1106_p1, %p1384_p13 }
  0x2f   : > { %p1109_p6 = pneg %p1108_p2 }
  0x31   : > { %p1114_p3 = pnand %p1112_p10, %p1109_p6 }
  0x33   : > { %1117 = shalt.err (!%p1114_p3)
}
  0x34   : > { %s1118_s11 = scalar_lea.vmem %s1372_s14, 2048  ;;  %p1126_p12 = scmp.lt.s32.totalorder %s1372_s14, %s1372_s14 }
  0x35   : > { %p1119_p5 = scmp.ne.s32.totalorder %s1372_s14, %s1118_s11  ;;  %p1127_p0 = scmp.lt.s32.totalorder %s1118_s11, %s1118_s11 }
  0x37   : > { %p1121_p7 = pnand %p1119_p5, %p1384_p13  ;;  %p1128_p1 = por %p1127_p0, %p1126_p12 }
  0x39   : > { %p1122_p9 = pneg %p1121_p7 }
  0x3b   : > { %p1129_p2 = pnand %p1128_p1, %p1122_p9 }
  0x3d   : > { %1132 = shalt.err (!%p1129_p2)
}
  0x3e   : > { %1013 = dma.hbm_to_vmem [thread:$0]  (!%p1368_p11), %s1628_s2, 2048, %s1372_s14, [#allocation6], %s1270_s13, %s1270_s13, %s1271_s15  }
  0x3f   : > { %s1133_s20 = scalar_lea.hbm %s1629_s3, 2048 }
  0x40   : > { %p1134_p6 = scmp.ne.s32.totalorder %s1629_s3, %s1133_s20  ;;  %p1140_p5 = scmp.lt.u32.totalorder %s1133_s20, %s1629_s3 }
  0x42   : > { %p1136_p10 = pnand %p1134_p6, %p1384_p13 }
  0x44   : > { %p1137_p3 = pneg %p1136_p10 }
  0x46   : > { %p1142_p7 = pnand %p1140_p5, %p1137_p3 }
  0x48   : > { %1145 = shalt.err (!%p1142_p7)
}
  0x49   : > { %s1146_s11 = scalar_lea.vmem %s247_s16, 2048  ;;  %p1154_p1 = scmp.lt.s32.totalorder %s247_s16, %s247_s16 }
  0x4a   : > { %p1147_p9 = scmp.ne.s32.totalorder %s247_s16, %s1146_s11  ;;  %p1155_p2 = scmp.lt.s32.totalorder %s1146_s11, %s1146_s11 }
  0x4c   : > { %p1149_p12 = pnand %p1147_p9, %p1384_p13  ;;  %p1156_p4 = por %p1155_p2, %p1154_p1 }
  0x4e   : > { %p1150_p0 = pneg %p1149_p12 }
  0x50   : > { %p1157_p8 = pnand %p1156_p4, %p1150_p0 }
  0x52   : > { %1160 = shalt.err (!%p1157_p8)
}
  0x53   : > { %1016 = dma.hbm_to_vmem [thread:$0]  (!%p1368_p11), %s1629_s3, 2048, %s247_s16, [#allocation9], %s1270_s13, %s1270_s13, %s1271_s15  }
  0x54   : > { %s1457_s22 = sadd.s32 1, %s1265_s27   ;;  %s32_s17 = sadd.s32 1, %s1261_s26 }
  0x55   : > { %s29_s12 = ssub.s32 %s1265_s27, %s1457_s22  ;;  %p39_p8 = scmp.ne.s32.totalorder %s1261_s26, %s1257_s25 }
  0x56   : > { %p30_p4 = scmp.eq.s32.totalorder %s29_s12, 0  ;;  %p40_p13 = scmp.eq.s32.totalorder %s1265_s27, 0 }
  0x57   : > { %p1028_p6 = scmp.lt.s32.totalorder %s1265_s27, 2  ;;  %p1644_p3 = scmp.eq.s32.totalorder %s1338_s28, 1 }
  0x58   : > { %s1467_s18 = scalar_select %p30_p4, %s1261_s26, %s32_s17  }
  0x59   : > { %p41_p10 = por %p40_p13, %p39_p8  ;;  %p1471_p5 = por %p1644_p3, %p39_p8 }
  0x5a   : > { %s269_s20 = sand.u32 1, %s1261_s26   ;;  %s748_s21 = sshll.u32 %s1265_s27, 7 }
  0x5b   : > { %s747_s16 = sshll.u32 %s269_s20, 3  ;;  %s1480_s23 = scalar_lea.hbm %s1626_s0, %s748_s21 }
  0x5c   : > { %s273_s29 = scalar_lea.vmem [#allocation2], %s747_s16  ;;  %p1482_p11 = pnand %p1028_p6, %p41_p10 }
  0x5d   : > { %s280_s10 = sshll.u32 %s273_s29, 4  ;;  %s270_s14 = scalar_lea.sflag [#allocation3], %s269_s20  ;;  %s1486_s10 = int_to_ptr.vmem [resolvable:$true] %s280_s10 }
  0x5e   : > { %s1161_s8 = scalar_lea.hbm %s1480_s23, 128  ;;  %p1163_p9 = pneg %p1482_p11 }
  0x5f   : > { %p1162_p7 = scmp.ne.s32.totalorder %s1480_s23, %s1161_s8  ;;  %s1166_s21 = scalar_lea.hbm %s1626_s0, 256 }
  0x60   : > { %p1167_p1 = scmp.lt.u32.totalorder %s1480_s23, %s1626_s0  ;;  %p1168_p2 = scmp.lt.u32.totalorder %s1166_s21, %s1161_s8 }
  0x61   : > { %p1164_p12 = pnand %p1163_p9, %p1162_p7  ;;  %p1170_p8 = scmp.lt.u32.totalorder %s1161_s8, %s1480_s23 }
  0x62   : > { %p1169_p4 = por %p1168_p2, %p1167_p1 }
  0x63   : > { %p1165_p0 = pneg %p1164_p12 }
  0x64   : > { %p1171_p13 = por %p1170_p8, %p1169_p4 }
  0x66   : > { %p1172_p6 = pnand %p1171_p13, %p1165_p0 }
  0x68   : > { %1175 = shalt.err (!%p1172_p6)
}
  0x69   : > { %s1176_s20 = scalar_lea.vmem %s1486_s10, 128  ;;  %s1272_s15 = smov [#allocation2]  }
  0x6a   : > { %p1177_p10 = scmp.ne.s32.totalorder %s1486_s10, %s1176_s20  ;;  %s1181_s29 = sshll.u32 %s1272_s15, 4  ;;  %s1182_s29 = int_to_ptr.vmem [resolvable:$false] %s1181_s29 }
  0x6b   : > { %s1183_s12 = scalar_lea.vmem %s1182_s29, 256  ;;  %p1184_p12 = scmp.lt.s32.totalorder %s1486_s10, %s1182_s29 }
  0x6c   : > { %p1179_p3 = pnand %p1177_p10, %p1163_p9  ;;  %p1185_p1 = scmp.lt.s32.totalorder %s1183_s12, %s1176_s20 }
  0x6e   : > { %p1180_p7 = pneg %p1179_p3  ;;  %p1186_p2 = por %p1185_p1, %p1184_p12 }
  0x70   : > { %p1187_p4 = pnand %p1186_p2, %p1180_p7 }
  0x72   : > { %1190 = shalt.err (!%p1187_p4)
}
  0x73   : > { %1020 = dma.hbm_to_vmem [thread:$0]  (!%p1482_p11), %s1480_s23, 128, %s1486_s10, %s270_s14  }
  0x74   : > { %p1647_p0 = scmp.ne.s32.totalorder %s1641_s9, 0 }
  0x75   : > { %s1516_s8 = sand.u32 (!%p1647_p0), 1, %s1257_s25   ;;  %p1648_p9 = scmp.ne.s32.totalorder (!%p1647_p0), %s1638_s30, 0 }
  0x76   : > { %289 = sbr.rel (%p1647_p0) target bundleno = 458 (0x1ca), region = 48  ;;  %s750_s17 = sshll.u32 (!%p1647_p0), %s1516_s8, 3 }
  0x77   : > { %s292_s21 = scalar_lea.sflag (!%p1647_p0), [#allocation3], %s1516_s8  ;;  %s1522_s16 = scalar_lea.vmem (!%p1647_p0), [#allocation2], %s750_s17 }
  0x7d   : > { %1236 = dma.done.wait (%p1648_p9), %s292_s21, 128  }
  0x7e   : > { %1238 = vsyncadd (%p1648_p9), %s292_s21, 4294967168  ;;  %p1649_p11 = scmp.eq.s32.totalorder %s1338_s28, 0 }
  0x80   : > { %1240 = dma.done.wait (%p1649_p11), [#allocation6], 4096   ;;  %p1650_p8 = pmov %p1649_p11 }
  0x82   : > { %1242 = vsyncadd (%p1650_p8), [#allocation6], 4294963200  ;;  %p1651_p13 = pmov %p1650_p8 }
  0x83   : > { %p1652_p6 = pmov %p1650_p8 }
  0x84   : > { %1244 = dma.done.wait (%p1651_p13), [#allocation9], 2048  }
  0x85   : > { %1246 = vsyncadd (%p1652_p6), [#allocation9], 4294965248  ;;  %v1273_v0 = vmov 0.0|0.0   ;;  %vm1274_vm0 = vmmov 0   ;;  %v1275_v1 = vmov 0.0   ;;  %v339_v2 = vld [vmem:[#allocation5] sm:$0xff] }
  0x86   : > { %919 = vmatprep.subr.bf16.mxu0 %v1273_v0  ;;  %943 = vmatprep.subr.bf16.mxu1 %v1273_v0  ;;  %v340_v3 = vld [vmem:[#allocation5 + $0x8] sm:$0xff]  ;;  %v432_v4 = vld [vmem:[#allocation7] sm:$0xff]  ;;  %v341_v7 = vld [vmem:[#allocation5 + $0x10] sm:$0xff]  ;;  %s760_s13 = sshll.u32 %s1338_s28, 7  ;;  %s337_s20 = scalar_lea.vmem [#allocation10], %s750_s17 }
  0x87   : > { %846 = vmatprep.mubr.msk.f32.mxu0 %vm1274_vm0, %v1275_v1  ;;  %881 = vmatprep.mubr.msk.f32.mxu1 %vm1274_vm0, %v1275_v1  ;;  %v920_v5 = vpack.c.bf16 %v340_v3, %v339_v2  ;;  %v433_v6 = vld [vmem:[#allocation7 + $0x8] sm:$0xff]  ;;  %v342_v8 = vld [vmem:[#allocation5 + $0x18] sm:$0xff]  ;;  %v434_v10 = vld [vmem:[#allocation7 + $0x10] sm:$0xff]  ;;  %s642_s15 = sshll.u32 %s337_s20, 4  ;;  %s1582_s21 = scalar_lea.hbm %s1633_s7, %s760_s13  ;;  %s1584_s15 = int_to_ptr.vmem [resolvable:$true] %s642_s15 }
  0x88   : > { %v944_v9 = vpack.c.bf16 %v433_v6, %v432_v4  ;;  %v435_v11 = vld [vmem:[#allocation7 + $0x18] sm:$0xff]  ;;  %v923_v12 = vpack.c.bf16 %v342_v8, %v341_v7  ;;  %v343_v14 = vld [vmem:[#allocation5 + $0x20] sm:$0xff]  ;;  %v344_v15 = vld [vmem:[#allocation5 + $0x28] sm:$0xff]  ;;  %s1191_s30 = scalar_lea.vmem %s1584_s15, 128  ;;  %s1276_s28 = smov [#allocation10]  }
  0x89   : > { %921 = vmatpush3.bf16.msra.mxu0 %v920_v5  ;;  %v947_v13 = vpack.c.bf16 %v435_v11, %v434_v10  ;;  %v436_v16 = vld [vmem:[#allocation7 + $0x20] sm:$0xff]  ;;  %v437_v17 = vld [vmem:[#allocation7 + $0x28] sm:$0xff]  ;;  %v926_v18 = vpack.c.bf16 %v344_v15, %v343_v14  ;;  %v345_v20 = vld [vmem:[#allocation5 + $0x30] sm:$0xff]  ;;  %p1192_p10 = scmp.ne.s32.totalorder %s1584_s15, %s1191_s30  ;;  %s1195_s17 = sshll.u32 %s1276_s28, 4  ;;  %s1196_s17 = int_to_ptr.vmem [resolvable:$false] %s1195_s17 }
  0x8a   : > { %945 = vmatpush3.bf16.msra.mxu1 %v944_v9  ;;  %922 = vmatprep.subr.bf16.mxu0 %v1273_v0  ;;  %v950_v19 = vpack.c.bf16 %v437_v17, %v436_v16  ;;  %v346_v21 = vld [vmem:[#allocation5 + $0x38] sm:$0xff]  ;;  %v438_v22 = vld [vmem:[#allocation7 + $0x30] sm:$0xff]  ;;  %v347_v26 = vld [vmem:[#allocation5 + $0x40] sm:$0xff]  ;;  %s1197_s9 = scalar_lea.vmem %s1196_s17, 256  ;;  %p1198_p12 = scmp.lt.s32.totalorder %s1584_s15, %s1196_s17 }
  0x8b   : > { %946 = vmatprep.subr.bf16.mxu1 %v1273_v0  ;;  %v439_v23 = vld [vmem:[#allocation7 + $0x38] sm:$0xff]  ;;  %v929_v24 = vpack.c.bf16 %v346_v21, %v345_v20  ;;  %v348_v27 = vld [vmem:[#allocation5 + $0x48] sm:$0xff]  ;;  %v440_v28 = vld [vmem:[#allocation7 + $0x40] sm:$0xff]  ;;  %p1193_p3 = pnand %p1192_p10, %p1471_p5  ;;  %p1199_p1 = scmp.lt.s32.totalorder %s1197_s9, %s1191_s30 }
  0x8c   : > { %v953_v25 = vpack.c.bf16 %v439_v23, %v438_v22  ;;  %v441_v29 = vld [vmem:[#allocation7 + $0x48] sm:$0xff]  ;;  %v932_v30 = vpack.c.bf16 %v348_v27, %v347_v26  ;;  %v349_v32 = vld [vmem:[#allocation5 + $0x50] sm:$0xff]  ;;  %v350_v33 = vld [vmem:[#allocation5 + $0x58] sm:$0xff] }
  0x8d   : > { %924 = vmatpush3.bf16.msra.mxu0 %v923_v12  ;;  %v956_v31 = vpack.c.bf16 %v441_v29, %v440_v28  ;;  %v442_v34 = vld [vmem:[#allocation7 + $0x50] sm:$0xff]  ;;  %v443_v35 = vld [vmem:[#allocation7 + $0x58] sm:$0xff]  ;;  %v935_v36 = vpack.c.bf16 %v350_v33, %v349_v32  ;;  %v351_v38 = vld [vmem:[#allocation5 + $0x60] sm:$0xff]  ;;  %p1194_p7 = pneg %p1193_p3  ;;  %p1200_p2 = por %p1199_p1, %p1198_p12 }
  0x8e   : > { %948 = vmatpush3.bf16.msra.mxu1 %v947_v13  ;;  %925 = vmatprep.subr.bf16.mxu0 %v1273_v0  ;;  %v959_v37 = vpack.c.bf16 %v443_v35, %v442_v34  ;;  %v352_v39 = vld [vmem:[#allocation5 + $0x68] sm:$0xff]  ;;  %v444_v40 = vld [vmem:[#allocation7 + $0x60] sm:$0xff]  ;;  %v353_v44 = vld [vmem:[#allocation5 + $0x70] sm:$0xff] }
  0x8f   : > { %949 = vmatprep.subr.bf16.mxu1 %v1273_v0  ;;  %v445_v41 = vld [vmem:[#allocation7 + $0x68] sm:$0xff]  ;;  %v938_v42 = vpack.c.bf16 %v352_v39, %v351_v38  ;;  %v354_v45 = vld [vmem:[#allocation5 + $0x78] sm:$0xff]  ;;  %v446_v46 = vld [vmem:[#allocation7 + $0x70] sm:$0xff]  ;;  %p1201_p4 = pnand %p1200_p2, %p1194_p7 }
  0x90   : > { %v962_v43 = vpack.c.bf16 %v445_v41, %v444_v40  ;;  %v447_v47 = vld [vmem:[#allocation7 + $0x78] sm:$0xff]  ;;  %v941_v48 = vpack.c.bf16 %v354_v45, %v353_v44  ;;  %v525_v50 = vld [vmem:[#allocation8] sm:$0xff]  ;;  %v526_v51 = vld [vmem:[#allocation8 + $0x8] sm:$0xff] }
  0x91   : > { %927 = vmatpush3.bf16.msra.mxu0 %v926_v18  ;;  %v965_v49 = vpack.c.bf16 %v447_v47, %v446_v46  ;;  %v338_v52 = vld [vmem:[%s1522_s16] sm:$0xff]  ;;  %v968_v53 = vpack.c.bf16 %v526_v51, %v525_v50  ;;  %v529_v57 = vld [vmem:[#allocation8 + $0x20] sm:$0xff]  ;;  %v530_v58 = vld [vmem:[#allocation8 + $0x28] sm:$0xff]  ;;  %s629_s16 = scalar_lea.sflag [#allocation4], %s1516_s8 }
  0x92   : > { %951 = vmatpush3.bf16.msra.mxu1 %v950_v19  ;;  %928 = vmatprep.subr.bf16.mxu0 %v1273_v0  ;;  %v527_v54 = vld [vmem:[#allocation8 + $0x10] sm:$0xff]  ;;  %v528_v55 = vld [vmem:[#allocation8 + $0x18] sm:$0xff]  ;;  %v974_v59 = vpack.c.bf16 %v530_v58, %v529_v57  ;;  %v533_v63 = vld [vmem:[#allocation8 + $0x40] sm:$0xff] }
  0x93   : > { %952 = vmatprep.subr.bf16.mxu1 %v1273_v0  ;;  %v971_v56 = vpack.c.bf16 %v528_v55, %v527_v54  ;;  %v531_v60 = vld [vmem:[#allocation8 + $0x30] sm:$0xff]  ;;  %v532_v61 = vld [vmem:[#allocation8 + $0x38] sm:$0xff]  ;;  %v534_v2 = vld [vmem:[#allocation8 + $0x48] sm:$0xff] }
  0x94   : > { %v977_v62 = vpack.c.bf16 %v532_v61, %v531_v60  ;;  %v980_v3 = vpack.c.bf16 %v534_v2, %v533_v63  ;;  %v535_v4 = vld [vmem:[#allocation8 + $0x50] sm:$0xff]  ;;  %v536_v5 = vld [vmem:[#allocation8 + $0x58] sm:$0xff]  ;;  %v537_v6 = vld [vmem:[#allocation8 + $0x60] sm:$0xff] }
  0x95   : > { %930 = vmatpush3.bf16.msra.mxu0 %v929_v24  ;;  %v538_v7 = vld [vmem:[#allocation8 + $0x68] sm:$0xff]  ;;  %v539_v9 = vld [vmem:[#allocation8 + $0x70] sm:$0xff]  ;;  %v540_v10 = vld [vmem:[#allocation8 + $0x78] sm:$0xff] }
  0x96   : > { %954 = vmatpush3.bf16.msra.mxu1 %v953_v25  ;;  %931 = vmatprep.subr.bf16.mxu0 %v1273_v0  ;;  %v986_v8 = vpack.c.bf16 %v538_v7, %v537_v6  ;;  %v989_v11 = vpack.c.bf16 %v540_v10, %v539_v9  ;;  %v755_v12 = vld [vmem:[%s1630_s4] ss:$0 sm:$0xff] }
  0x97   : > { %955 = vmatprep.subr.bf16.mxu1 %v1273_v0  ;;  %v756_v13 = vld [vmem:[%s1631_s5] ss:$0 sm:$0xff] }
  0x99   : > { %933 = vmatpush3.bf16.msra.mxu0 %v932_v30 }
  0x9a   : > { %957 = vmatpush3.bf16.msra.mxu1 %v956_v31  ;;  %934 = vmatprep.subr.bf16.mxu0 %v1273_v0 }
  0x9b   : > { %958 = vmatprep.subr.bf16.mxu1 %v1273_v0 }
  0x9d   : > { %936 = vmatpush3.bf16.msra.mxu0 %v935_v36 }
  0x9e   : > { %960 = vmatpush3.bf16.msra.mxu1 %v959_v37  ;;  %937 = vmatprep.subr.bf16.mxu0 %v1273_v0 }
  0x9f   : > { %961 = vmatprep.subr.bf16.mxu1 %v1273_v0 }
  0xa1   : > { %939 = vmatpush3.bf16.msra.mxu0 %v938_v42 }
  0xa2   : > { %963 = vmatpush3.bf16.msra.mxu1 %v962_v43  ;;  %940 = vmatprep.subr.bf16.mxu0 %v1273_v0 }
  0xa3   : > { %964 = vmatprep.subr.bf16.mxu1 %v1273_v0 }
  0xa5   : > { %942 = vmatpush3.bf16.msra.mxu0 %v941_v48 }
  0xa6   : > { %966 = vmatpush3.bf16.msra.mxu1 %v965_v49  ;;  %967 = vmatprep.subr.bf16.mxu0 %v1273_v0 }
  0xa8   : > { %847 = vmatmul.mubr.f32.vlgmr.msra.gmra.mrb[0].mxu0 %v338_v52 }
  0xa9   : > { %882 = vmatmul.mubr.f32.vlgmr.msra.gmra.mrb[0].mxu1 %v338_v52  ;;  %969 = vmatpush3.bf16.msra.mxu0 %v968_v53 }
  0xaa   : > { %970 = vmatprep.subr.bf16.mxu0 %v1273_v0  ;;  %916 = vmatprep.mubr.msk.f32.mxu0 %vm1274_vm0, %v1275_v1  ;;  %v983_v1 = vpack.c.bf16 %v536_v5, %v535_v4 }
  0xad   : > { %972 = vmatpush3.bf16.msra.mxu0 %v971_v56 }
  0xae   : > { %973 = vmatprep.subr.bf16.mxu0 %v1273_v0 }
  0xb1   : > { %975 = vmatpush3.bf16.msra.mxu0 %v974_v59 }
  0xb2   : > { %976 = vmatprep.subr.bf16.mxu0 %v1273_v0 }
  0xb5   : > { %978 = vmatpush3.bf16.msra.mxu0 %v977_v62 }
  0xb6   : > { %979 = vmatprep.subr.bf16.mxu0 %v1273_v0 }
  0xb9   : > { %981 = vmatpush3.bf16.msra.mxu0 %v980_v3 }
  0xba   : > { %982 = vmatprep.subr.bf16.mxu0 %v1273_v0 }
  0xbd   : > { %984 = vmatpush3.bf16.msra.mxu0 %v983_v1 }
  0xbe   : > { %985 = vmatprep.subr.bf16.mxu0 %v1273_v0 }
  0xc1   : > { %987 = vmatpush3.bf16.msra.mxu0 %v986_v8 }
  0xc2   : > { %988 = vmatprep.subr.bf16.mxu0 %v1273_v0  ;;  %v757_v0 = vld [vmem:[%s1632_s6] ss:$0 sm:$0xff] }
  0xc5   : > { %990 = vmatpush3.bf16.msra.mxu0 %v989_v11 }
  0xc8   : > { %917 = vmatmul.mubr.f32.vlgmr.msra.gmra.mrb[2].mxu0 %v338_v52 }
 0x17b   : > { %v428_v14 = vpop.f32.mrb[0].mxu0 }
 0x17c   : > { %v429_v15 = vadd.f32 %v755_v12, %v428_v14  ;;  %v848_v16 = vpop.f32.mrb[1].mxu0  ;;  %v521_v17 = vpop.f32.mrb[0].mxu1 }
 0x17d   : > { %v522_v18 = vadd.f32 %v756_v13, %v521_v17  ;;  %v883_v19 = vpop.f32.mrb[1].mxu1 }
 0x17f   : > { %v624_v20 = vsub.f32 %v429_v15, %v522_v18 }
 0x19b   : > { %v614_v21 = vpop.f32.mrb[2].mxu0 }
 0x19c   : > { %v615_v22 = vadd.f32 %v757_v0, %v614_v21  ;;  %v918_v23 = vpop.f32.mrb[3].mxu0 }
 0x19e   : > { %v758_v24 = vmul.f32 -1.442695, %v615_v22 }
 0x1a0   : > { %1073 = vpow2.f32 %v758_v24 }
 0x1aa   : > { %v1074_v25 = vpop.eup %1073 }
 0x1ab   : > { %v621_v26 = vadd.f32 1.0, %v1074_v25 }
 0x1ad   : > { %1075 = vrcp.f32 %v621_v26 }
 0x1b7   : > { %v1076_v27 = vpop.eup %1075 }
 0x1b8   : > { %v625_v28 = vmul.f32 %v1076_v27, %v624_v20 }
 0x1ba   : > { %v626_v29 = vadd.f32 %v625_v28, %v522_v18 }
 0x1bc   : > { %627 = vst [vmem:[%s337_s20] sm:$0xff] %v626_v29 }
 0x1bd   : > { %1204 = shalt.err (!%p1201_p4)
}
 0x1be   : > { %s1205_s8 = scalar_lea.hbm %s1582_s21, 128  ;;  %s1209_s11 = scalar_lea.hbm %s1633_s7, 256 }
 0x1bf   : > { %p1206_p0 = scmp.ne.s32.totalorder %s1582_s21, %s1205_s8  ;;  %p1210_p8 = scmp.lt.u32.totalorder %s1582_s21, %s1633_s7 }
 0x1c0   : > { %p1211_p13 = scmp.lt.u32.totalorder %s1209_s11, %s1205_s8  ;;  %p1213_p10 = scmp.lt.u32.totalorder %s1205_s8, %s1582_s21 }
 0x1c1   : > { %p1207_p9 = pnand %p1206_p0, %p1471_p5 }
 0x1c2   : > { %p1212_p6 = por %p1211_p13, %p1210_p8 }
 0x1c3   : > { %p1208_p11 = pneg %p1207_p9 }
 0x1c4   : > { %p1214_p3 = por %p1213_p10, %p1212_p6 }
 0x1c6   : > { %p1215_p7 = pnand %p1214_p3, %p1208_p11 }
 0x1c8   : > { %1218 = shalt.err (!%p1215_p7)
}
 0x1c9   : > { %1005 = dma.vmem_to_hbm [thread:$0]  (%p1471_p5), %s1584_s15, 128, %s1582_s21, %s629_s16  }
 0x1ca PF: > { %s1653_s20 = sld [smem:[#allocation15_spill]]  ;;  %s654_s29 = sand.u32 1, %s1253_s24  }
 0x1cb   : > { %p1655_p1 = scmp.ge.s32.totalorder %s1265_s27, 2  ;;  %s655_s12 = scalar_lea.sflag [#allocation4], %s654_s29 }
 0x1d0   : > { %p1654_p12 = scmp.ne.s32.totalorder %s1653_s20, 0 }
 0x1d2   : > { %p1022_p2 = pnand %p1655_p1, %p1654_p12 }
 0x1d4   : > { %1248 = dma.done.wait (!%p1022_p2), %s655_s12, 128  }
 0x1d5   : > { %1250 = vsyncadd (!%p1022_p2), %s655_s12, 4294967168  ;;  %p22_p4 = scmp.ge.s32.totalorder %s1457_s22, 4   ;;  %s1656_s24 = smov %s1257_s25 }
 0x1d6   : > { %s1657_s25 = smov %s1261_s26  ;;  %s1658_s26 = smov %s1467_s18 }
 0x1d7   : > { %s1659_s27 = smov %s1457_s22  ;;  %24 = sbr.rel (!%p22_p4) target bundleno = 7 (0x7), region = 105 }
 0x1de   :  { %660 = vsyncpa [#allocation3], 1 }
 0x1df   :  { %662 = vsyncpa [#allocation3 + $0x1], 1 }
 0x1e0   :  { %663 = vsyncpa [#allocation6], 1 }
 0x1e1   :  { %664 = vsyncpa [#allocation9], 1 }
 0x1e2   :  { %665 = vsyncpa [#allocation4], 1 }
 0x1e3   :  { %667 = vsyncpa [#allocation4 + $0x1], 1 }

</bundles_post_ra>
